<compile_context>
chip_gen: v6e
topology: v6e:2x2x1
jax: 0.10.0
libtpu: 0.0.40
codegen_flags: <defaults>
</compile_context>

<pallas_src>
import functools

import jax
import jax.numpy as jnp
from jax.experimental import pallas as pl
from jax.experimental.pallas import tpu as pltpu

SMOOTH = 0.001
LANE = 128
SUB = 8                                # rows are kept a multiple of this
TARGET_BLOCK_BYTES = 2 * 1024 * 1024   # ~2 MiB per input per buffer (~roofline plateau)
VMEM_LIMIT_BYTES = 32 * 1024 * 1024    # safe on v5e/v6e (128 MiB phys) and v7x (64 MiB)


def _dice_partial_kernel(x_ref, t_ref, o_ref, *, rows, block_rows, bpc, need_mask):
    """Accumulates per-core partials of inter = sum(x*t) and denom = sum(x+t).

    Grid: (ncores, blocks_per_core). Axis 0 is 'parallel', axis 1 is the
    sequential reduction axis. Output block (1, 2, 8, 128) stays resident
    across axis 1 and is used directly as the accumulator.
    """
    c = pl.program_id(0)
    i = pl.program_id(1)

    @pl.when(i == 0)
    def _():
        o_ref[...] = jnp.zeros_like(o_ref)

    def accumulate(x, t):
        x = x.astype(jnp.float32)
        t = t.astype(jnp.float32)
        # Reduce the block to one vreg-sized (8, 128) partial before touching
        # the accumulator: VPU-only, 1 vld + 1 vst per accumulator per step.
        o_ref[0, 0] += jnp.sum((x * t).reshape(-1, SUB, LANE), axis=0)
        o_ref[0, 1] += jnp.sum((x + t).reshape(-1, SUB, LANE), axis=0)

    if need_mask:
        blk = c * bpc + i
        # True only for the ragged last block and any clamped duplicate block.
        edge = (blk + 1) * block_rows > rows

        @pl.when(edge)
        def _():
            row0 = blk * block_rows
            rid = jax.lax.broadcasted_iota(jnp.int32, (block_rows, LANE), 0) + row0
            valid = rid < rows
            # Mask the operands (not the product) so stale VMEM garbage in the
            # padded region can never propagate NaNs through the multiply.
            accumulate(jnp.where(valid, x_ref[...].astype(jnp.float32), 0.0),
                       jnp.where(valid, t_ref[...].astype(jnp.float32), 0.0))

        @pl.when(jnp.logical_not(edge))
        def _():
            accumulate(x_ref[...], t_ref[...])
    else:
        accumulate(x_ref[...], t_ref[...])


def dice_loss(inputs, target, smooth=SMOOTH):
    """1 - dice(inputs, target), matching the PyTorch DiceLoss.forward.

    Works for any matching shapes/dtypes; casting to f32 happens inside the
    kernel. Returns a scalar f32. The PyTorch `weight` buffer is registered
    but never used by dice(); it is therefore omitted here.
    """
    assert inputs.shape == target.shape

    xf = jnp.ravel(inputs)   # reshape only: no copy, no upcast
    tf = jnp.ravel(target)
    total = xf.size

    chunk = SUB * LANE                     # keep rows a multiple of 8
    main = (total // chunk) * chunk

    inter_tail = jnp.float32(0.0)
    denom_tail = jnp.float32(0.0)
    if main != total:
        # Small (<1024 element) ragged tail: reduce with plain jnp ops.
        xt = xf[main:].astype(jnp.float32)
        tt = tf[main:].astype(jnp.float32)
        inter_tail = jnp.sum(xt * tt)
        denom_tail = jnp.sum(xt) + jnp.sum(tt)

    if main == 0:
        inter = inter_tail
        denom = denom_tail
    else:
        rows = main // LANE                # multiple of 8 by construction
        x2 = (xf if main == total else xf[:main]).reshape(rows, LANE)
        t2 = (tf if main == total else tf[:main]).reshape(rows, LANE)

        # Dtype-aware block height targeting ~2 MiB per input block.
        itemsize = max(x2.dtype.itemsize, t2.dtype.itemsize)
        tm_max = max(SUB, (TARGET_BLOCK_BYTES // (LANE * itemsize)) // SUB * SUB)
        block_rows = rows if rows <= tm_max else tm_max
        n_blocks = (rows + block_rows - 1) // block_rows
        # Split the reduction across TensorCores when there is enough work.
        ncores = 2 if n_blocks >= 2 else 1
        bpc = (n_blocks + ncores - 1) // ncores
        need_mask = (ncores * bpc * block_rows) != rows
        last_block = n_blocks - 1

        def in_map(c, i):
            # Clamp so the DMA never targets an out-of-range block index;
            # the (gated) in-kernel row mask zeroes duplicated/ragged rows.
            return (jnp.minimum(c * bpc + i, last_block), 0)

        kernel = functools.partial(
            _dice_partial_kernel,
            rows=rows, block_rows=block_rows, bpc=bpc, need_mask=need_mask)

        partials = pl.pallas_call(
            kernel,
            out_shape=jax.ShapeDtypeStruct((ncores, 2, SUB, LANE), jnp.float32),
            grid_spec=pltpu.PrefetchScalarGridSpec(
                num_scalar_prefetch=0,
                grid=(ncores, bpc),
                in_specs=[
                    pl.BlockSpec((block_rows, LANE), in_map),
                    pl.BlockSpec((block_rows, LANE), in_map),
                ],
                out_specs=pl.BlockSpec((1, 2, SUB, LANE), lambda c, i: (c, 0, 0, 0)),
            ),
            compiler_params=pltpu.CompilerParams(
                dimension_semantics=("parallel", "arbitrary"),
                vmem_limit_bytes=VMEM_LIMIT_BYTES,
            ),
        )(x2, t2)

        inter = jnp.sum(partials[:, 0]) + inter_tail
        denom = jnp.sum(partials[:, 1]) + denom_tail

    dice_coef = (2.0 * inter + smooth) / (denom + smooth)
    return (1.0 - dice_coef).astype(jnp.float32)


def _dice_ref(inputs, target, smooth=SMOOTH):
    iflat = jnp.ravel(inputs).astype(jnp.float32)
    tflat = jnp.ravel(target).astype(jnp.float32)
    inter = jnp.sum(iflat * tflat)
    return 1.0 - (2.0 * inter + smooth) / (jnp.sum(iflat) + jnp.sum(tflat) + smooth)


if __name__ == "__main__":
    key = jax.random.PRNGKey(0)
    k1, k2, k3, k4, k5, k6 = jax.random.split(key, 6)

    # Primary check: NCHW segmentation-style input, N=2, C=4, H=W=16.
    x = jax.nn.sigmoid(jax.random.normal(k1, (2, 4, 16, 16), dtype=jnp.float32))
    t = (jax.random.uniform(k2, (2, 4, 16, 16)) > 0.5).astype(jnp.float32)
    loss = dice_loss(x, t)
    jax.block_until_ready(loss)
    ref = _dice_ref(x, t)
    assert jnp.allclose(loss, ref, rtol=1e-5, atol=1e-5), (loss, ref)

    # Secondary check: single full-extent block plus <1024-element jnp tail.
    x2 = jax.nn.sigmoid(jax.random.normal(k3, (1, 3, 211, 211), dtype=jnp.float32))
    t2 = (jax.random.uniform(k4, (1, 3, 211, 211)) > 0.5).astype(jnp.float32)
    loss2 = dice_loss(x2, t2)
    jax.block_until_ready(loss2)
    ref2 = _dice_ref(x2, t2)
    assert jnp.allclose(loss2, ref2, rtol=1e-5, atol=1e-5), (loss2, ref2)

    # Third check: multi-block grid, 2-way core split, gated edge masking and
    # the clamped duplicate block (n_blocks odd), plus the jnp tail path.
    x3 = jax.nn.sigmoid(jax.random.normal(k5, (2, 3, 600, 600), dtype=jnp.float32))
    t3 = (jax.random.uniform(k6, (2, 3, 600, 600)) > 0.5).astype(jnp.float32)
    loss3 = dice_loss(x3, t3)
    jax.block_until_ready(loss3)
    ref3 = _dice_ref(x3, t3)
    assert jnp.allclose(loss3, ref3, rtol=1e-4, atol=1e-5), (loss3, ref3)

    print("KERNEL_OK")
</pallas_src>

<mosaic_0001>
module attributes {stable_mosaic.version = 11 : i64} {
  func.func @_dice_partial_kernel(%arg0: i32, %arg1: i32, %arg2: memref<16x128xf32, #tpu.memory_space<vmem>>, %arg3: memref<16x128xf32, #tpu.memory_space<vmem>>, %arg4: memref<1x2x8x128xf32, #tpu.memory_space<vmem>>) attributes {dimension_semantics = [#tpu.dimension_semantics<parallel>, #tpu.dimension_semantics<arbitrary>], iteration_bounds = array<i64: 1, 1>, scalar_prefetch = 0 : i64, scratch_operands = 0 : i64, tpu.core_type = #tpu.core_type<tc>, window_params = [{transform_indices = @transform_0, window_bounds = array<i64: 16, 128>}, {transform_indices = @transform_1, window_bounds = array<i64: 16, 128>}, {transform_indices = @transform_2, window_bounds = array<i64: 1, 2, 8, 128>}]} {
    %c0_i32 = arith.constant 0 : i32
    %0 = arith.cmpi eq, %arg1, %c0_i32 : i32
    %1 = arith.extui %0 : i1 to i32
    %c0_i32_0 = arith.constant 0 : i32
    %2 = arith.cmpi ne, %1, %c0_i32_0 : i32
    scf.if %2 {
      %cst_20 = arith.constant 0.000000e+00 : f32
      %23 = vector.broadcast %cst_20 : f32 to vector<1x2x8x128xf32>
      %c0_21 = arith.constant 0 : index
      %c0_22 = arith.constant 0 : index
      %c0_23 = arith.constant 0 : index
      %c0_24 = arith.constant 0 : index
      %24 = vector.load %arg4[%c0_21, %c0_22, %c0_23, %c0_24] : memref<1x2x8x128xf32, #tpu.memory_space<vmem>>, vector<1x2x8x128xf32>
      tpu.vector_store %arg4[%c0_21, %c0_22, %c0_23, %c0_24], %23 {strides = array<i32>} : memref<1x2x8x128xf32, #tpu.memory_space<vmem>>, vector<1x2x8x128xf32>,
    } else {
    }
    %c0 = arith.constant 0 : index
    %c0_1 = arith.constant 0 : index
    %3 = vector.load %arg2[%c0, %c0_1] : memref<16x128xf32, #tpu.memory_space<vmem>>, vector<16x128xf32>
    %c0_2 = arith.constant 0 : index
    %c0_3 = arith.constant 0 : index
    %4 = vector.load %arg3[%c0_2, %c0_3] : memref<16x128xf32, #tpu.memory_space<vmem>>, vector<16x128xf32>
    %c0_4 = arith.constant 0 : index
    %c0_5 = arith.constant 0 : index
    %c0_6 = arith.constant 0 : index
    %c0_7 = arith.constant 0 : index
    %5 = vector.load %arg4[%c0_4, %c0_5, %c0_6, %c0_7] : memref<1x2x8x128xf32, #tpu.memory_space<vmem>>, vector<1x1x8x128xf32>
    %6 = vector.shape_cast %5 : vector<1x1x8x128xf32> to vector<8x128xf32>
    %7 = arith.mulf %3, %4 : vector<16x128xf32>
    %8 = vector.shape_cast %7 : vector<16x128xf32> to vector<2x8x128xf32>
    %cst = arith.constant dense<0.000000e+00> : vector<8x128xf32>
    %9 = vector.multi_reduction <add>, %8, %cst [0] : vector<2x8x128xf32> to vector<8x128xf32>
    %10 = arith.addf %6, %9 : vector<8x128xf32>
    %c0_8 = arith.constant 0 : index
    %c0_9 = arith.constant 0 : index
    %c0_10 = arith.constant 0 : index
    %c0_11 = arith.constant 0 : index
    %11 = vector.load %arg4[%c0_8, %c0_9, %c0_10, %c0_11] : memref<1x2x8x128xf32, #tpu.memory_space<vmem>>, vector<1x1x8x128xf32>
    %12 = vector.shape_cast %11 : vector<1x1x8x128xf32> to vector<8x128xf32>
    %13 = vector.shape_cast %10 : vector<8x128xf32> to vector<1x1x8x128xf32>
    tpu.vector_store %arg4[%c0_8, %c0_9, %c0_10, %c0_11], %13 {strides = array<i32>} : memref<1x2x8x128xf32, #tpu.memory_space<vmem>>, vector<1x1x8x128xf32>,
    %c0_12 = arith.constant 0 : index
    %c1 = arith.constant 1 : index
    %c0_13 = arith.constant 0 : index
    %c0_14 = arith.constant 0 : index
    %14 = vector.load %arg4[%c0_12, %c1, %c0_13, %c0_14] : memref<1x2x8x128xf32, #tpu.memory_space<vmem>>, vector<1x1x8x128xf32>
    %15 = vector.shape_cast %14 : vector<1x1x8x128xf32> to vector<8x128xf32>
    %16 = arith.addf %3, %4 : vector<16x128xf32>
    %17 = vector.shape_cast %16 : vector<16x128xf32> to vector<2x8x128xf32>
    %cst_15 = arith.constant dense<0.000000e+00> : vector<8x128xf32>
    %18 = vector.multi_reduction <add>, %17, %cst_15 [0] : vector<2x8x128xf32> to vector<8x128xf32>
    %19 = arith.addf %15, %18 : vector<8x128xf32>
    %c0_16 = arith.constant 0 : index
    %c1_17 = arith.constant 1 : index
    %c0_18 = arith.constant 0 : index
    %c0_19 = arith.constant 0 : index
    %20 = vector.load %arg4[%c0_16, %c1_17, %c0_18, %c0_19] : memref<1x2x8x128xf32, #tpu.memory_space<vmem>>, vector<1x1x8x128xf32>
    %21 = vector.shape_cast %20 : vector<1x1x8x128xf32> to vector<8x128xf32>
    %22 = vector.shape_cast %19 : vector<8x128xf32> to vector<1x1x8x128xf32>
    tpu.vector_store %arg4[%c0_16, %c1_17, %c0_18, %c0_19], %22 {strides = array<i32>} : memref<1x2x8x128xf32, #tpu.memory_space<vmem>>, vector<1x1x8x128xf32>,
    return
  }
  func.func @transform_0(%arg0: i32, %arg1: i32) -> (i32, i32) {
    %c1_i32 = arith.constant 1 : i32
    %0 = arith.muli %arg0, %c1_i32 : i32
    %1 = arith.addi %0, %arg1 : i32
    %c0_i32 = arith.constant 0 : i32
    %2 = arith.minsi %1, %c0_i32 : i32
    %c0_i32_0 = arith.constant 0 : i32
    %c0_i32_1 = arith.constant 0 : i32
    return %2, %c0_i32_0 : i32, i32
  }
  func.func @transform_1(%arg0: i32, %arg1: i32) -> (i32, i32) {
    %c1_i32 = arith.constant 1 : i32
    %0 = arith.muli %arg0, %c1_i32 : i32
    %1 = arith.addi %0, %arg1 : i32
    %c0_i32 = arith.constant 0 : i32
    %2 = arith.minsi %1, %c0_i32 : i32
    %c0_i32_0 = arith.constant 0 : i32
    %c0_i32_1 = arith.constant 0 : i32
    return %2, %c0_i32_0 : i32, i32
  }
  func.func @transform_2(%arg0: i32, %arg1: i32) -> (i32, i32, i32, i32) {
    %c0_i32 = arith.constant 0 : i32
    %c0_i32_0 = arith.constant 0 : i32
    %c0_i32_1 = arith.constant 0 : i32
    %c0_i32_2 = arith.constant 0 : i32
    return %arg0, %c0_i32, %c0_i32_0, %c0_i32_1 : i32, i32, i32, i32
  }
}

</mosaic_0001>

<bundles_post_ra>
// kernel: tpu_custom_call.1
= control target key start
LH: loop header
LB: loop body
LE: loop exit
PB: predicated region body
PF: predicated region fallthrough
CT: control target
= control target key end

     0   :  { %7 = vsyncpa [#allocation3], 0  ;;  %s215_s0 = inlined_call_operand.hbm [shape: f32[16,128], index: 0, kind: input, shape index: {}]   ;;  %s216_s1 = inlined_call_operand.hbm [shape: f32[16,128], index: 1, kind: input, shape index: {}]   ;;  %s217_s2 = inlined_call_operand.hbm [shape: f32[1,2,8,128], index: 2, kind: output, shape index: {}]  }
   0x1   :  { %8 = vsyncpa [#allocation6], 0 }
   0x2   :  { %9 = vsyncpa [#allocation4], 0  ;;  %s177_s9 = smov [#allocation2]  }
   0x3   :  { %s21_s10 = sshll.u32 %s177_s9, 4  ;;  %s22_s10 = int_to_ptr.vmem [resolvable:$true] %s21_s10 }
   0x4   :  { %s119_s11 = scalar_lea.vmem %s22_s10, 256  ;;  %p124_p1 = scmp.lt.s32.totalorder %s22_s10, %s22_s10 }
   0x5   :  { %p120_p0 = scmp.ne.s32.totalorder %s22_s10, %s119_s11  ;;  %p125_p2 = scmp.lt.s32.totalorder %s119_s11, %s119_s11 }
   0x7   :  { %p126_p3 = por %p125_p2, %p124_p1 }
   0x9   :  { %p127_p4 = pnand %p126_p3, %p120_p0 }
   0xb   :  { %130 = shalt.err (!%p127_p4)
}
   0xc   :  { %s178_s12 = smov 128   ;;  %s179_s13 = smov 8  }
   0xd   :  { %27 = dma.hbm_to_vmem [thread:$0]  %s215_s0, 256, %s22_s10, [#allocation3], %s178_s12, %s178_s12, %s179_s13  }
   0xe   :  { %s180_s16 = smov [#allocation5]  }
   0xf   :  { %s39_s17 = sshll.u32 %s180_s16, 4  ;;  %s40_s17 = int_to_ptr.vmem [resolvable:$true] %s39_s17 }
  0x10   :  { %s139_s18 = scalar_lea.vmem %s40_s17, 256  ;;  %p144_p6 = scmp.lt.s32.totalorder %s40_s17, %s40_s17 }
  0x11   :  { %p140_p5 = scmp.ne.s32.totalorder %s40_s17, %s139_s18  ;;  %p145_p7 = scmp.lt.s32.totalorder %s139_s18, %s139_s18 }
  0x13   :  { %p146_p8 = por %p145_p7, %p144_p6 }
  0x15   :  { %p147_p9 = pnand %p146_p8, %p140_p5 }
  0x17   :  { %150 = shalt.err (!%p147_p9)
}
  0x18   :  { %45 = dma.hbm_to_vmem [thread:$0]  %s216_s1, 256, %s40_s17, [#allocation6], %s178_s12, %s178_s12, %s179_s13  }
  0x19   :  { %171 = dma.done.wait [#allocation3], 256  }
  0x1a   :  { %172 = vsyncadd [#allocation3], 4294967040 }
  0x1b   :  { %173 = dma.done.wait [#allocation6], 256  }
  0x1c   :  { %174 = vsyncadd [#allocation6], 4294967040  ;;  %v66_v0 = vld [vmem:[#allocation2] sm:$0xff]  ;;  %v67_v1 = vld [vmem:[#allocation2 + $0x8] sm:$0xff]  ;;  %s181_s0 = smov [#allocation7]  }
  0x1d   :  { %v68_v2 = vld [vmem:[#allocation5] sm:$0xff]  ;;  %v69_v3 = vld [vmem:[#allocation5 + $0x8] sm:$0xff]  ;;  %s88_s21 = sshll.u32 %s181_s0, 4  ;;  %s89_s21 = int_to_ptr.vmem [resolvable:$true] %s88_s21 }
  0x1e   :  { %v71_v4 = vmul.f32 %v68_v2, %v66_v0  ;;  %v78_v5 = vadd.f32 %v68_v2, %v66_v0  ;;  %v72_v6 = vmul.f32 %v69_v3, %v67_v1  ;;  %v79_v7 = vadd.f32 %v69_v3, %v67_v1  ;;  %s151_s1 = scalar_lea.vmem %s89_s21, 256  ;;  %p156_p11 = scmp.lt.s32.totalorder %s89_s21, %s89_s21 }
  0x1f   :  { %p152_p10 = scmp.ne.s32.totalorder %s89_s21, %s151_s1  ;;  %p157_p12 = scmp.lt.s32.totalorder %s151_s1, %s151_s1 }
  0x20   :  { %v73_v8 = vadd.f32 %v72_v6, %v71_v4  ;;  %v80_v9 = vadd.f32 %v79_v7, %v78_v5 }
  0x21   :  { %p158_p13 = por %p157_p12, %p156_p11 }
  0x22   :  { %75 = vst [vmem:[#allocation7] sm:$0xff] %v73_v8  ;;  %82 = vst [vmem:[#allocation7 + $0x8] sm:$0xff] %v80_v9 }
  0x23   :  { %p159_p0 = pnand %p158_p13, %p152_p10 }
  0x25   :  { %162 = shalt.err (!%p159_p0)
}
  0x26   :  { %94 = dma.vmem_to_hbm [thread:$0]  %s89_s21, 256, %s217_s2, [#allocation4], %s178_s12, %s178_s12, %s179_s13  }
  0x27   :  { %175 = dma.done.wait [#allocation4], 256  }
  0x28   :  { %176 = vsyncadd [#allocation4], 4294967040 }
  0x29   :  { %98 = vsyncpa [#allocation3], 1 }
  0x2a   :  { %99 = vsyncpa [#allocation6], 1 }
  0x2b   :  { %100 = vsyncpa [#allocation4], 1 }

</bundles_post_ra>
